<compile_context>
chip_gen: v7x
topology: tpu7x:2x2x1
jax: 0.10.0
libtpu: 0.0.40
codegen_flags: <defaults>
</compile_context>

<pallas_src>
import functools

import jax
import jax.numpy as jnp
from jax.experimental import pallas as pl
from jax.experimental.pallas import tpu as pltpu


def _round_up(x: int, m: int) -> int:
    return ((x + m - 1) // m) * m


def _vmem_limit_bytes() -> int:
    """Explicit scoped-VMEM budget (the default is only 16/32 MiB)."""
    try:
        kind = jax.devices()[0].device_kind.lower()
    except Exception:
        kind = ""
    if any(t in kind for t in ("v4", "v5", "v6")):
        return 100 * 1024 * 1024      # 128 MiB physical VMEM per TC
    return 56 * 1024 * 1024           # v7x (64 MiB/TC) and unknown chips


def skeleton_decoder_kernel(x_ref, w1_ref, b1_ref, w2_ref, b2_ref,
                            w3j_ref, b3j_ref, w3f_ref, b3f_ref,
                            joints_ref, feats_ref, h2_ref):
    j = pl.program_id(1)
    nf = pl.num_programs(1)

    # Layers 1 & 2 only on the first column step of each batch tile; the
    # (tile_b, 2*hidden) activation stays in VMEM scratch for all remaining
    # feature-column tiles of this batch tile.
    @pl.when(j == 0)
    def _():
        h1 = jnp.dot(x_ref[...], w1_ref[...], preferred_element_type=jnp.float32)
        h1 = jnp.maximum(h1 + b1_ref[...], 0.0).astype(w2_ref.dtype)
        h2 = jnp.dot(h1, w2_ref[...], preferred_element_type=jnp.float32)
        h2 = jnp.maximum(h2 + b2_ref[...], 0.0)
        h2_ref[...] = h2.astype(h2_ref.dtype)

    # Feature head: one lane-dense column tile per grid step (w3f streams
    # through the BlockSpec pipeline, overlapped with the MXU work).
    f = jnp.dot(h2_ref[...], w3f_ref[...], preferred_element_type=jnp.float32)
    feats_ref[...] = (f + b3f_ref[...]).astype(feats_ref.dtype)

    # Joints head (columns zero-padded to a multiple of 128 -> unmasked vst).
    # Its block index is constant over j, so the block stays VMEM-resident;
    # writing once on the last column step is sufficient.
    @pl.when(j == nf - 1)
    def _():
        jo = jnp.dot(h2_ref[...], w3j_ref[...], preferred_element_type=jnp.float32)
        joints_ref[...] = (jo + b3j_ref[...]).astype(joints_ref.dtype)


def prepare_params(params, num_joints, hidden_dim, compute_dtype=jnp.bfloat16):
    """One-time weight prep (hoisted out of the per-call jitted forward):
      * permute layer-3 columns from per-joint interleaved [3 | H] layout into
        a contiguous [joints | features] layout,
      * zero-pad the joints head to a multiple of 128 lanes,
      * cast matmul weights to the compute dtype (biases stay f32)."""
    w1, b1, w2, b2, w3, b3 = params
    out_per_joint = 3 + hidden_dim
    col = jnp.arange(num_joints * out_per_joint).reshape(num_joints, out_per_joint)
    joint_cols = col[:, :3].reshape(-1)     # (N*3,)
    feat_cols = col[:, 3:].reshape(-1)      # (N*H,)

    joints_dim = num_joints * 3
    joints_pad = _round_up(joints_dim, 128)
    pad = joints_pad - joints_dim

    b3_row = b3.reshape(1, -1)
    w3j, b3j = w3[:, joint_cols], b3_row[:, joint_cols]
    if pad:
        w3j = jnp.pad(w3j, ((0, 0), (0, pad)))
        b3j = jnp.pad(b3j, ((0, 0), (0, pad)))
    w3f, b3f = w3[:, feat_cols], b3_row[:, feat_cols]

    prep = (
        w1.astype(compute_dtype), b1.reshape(1, -1).astype(jnp.float32),
        w2.astype(compute_dtype), b2.reshape(1, -1).astype(jnp.float32),
        w3j.astype(compute_dtype), b3j.astype(jnp.float32),
        w3f.astype(compute_dtype), b3f.astype(jnp.float32),
    )
    return prep


@functools.partial(jax.jit, static_argnames=("num_joints", "hidden_dim", "out_dtype"))
def skeleton_decoder_forward(global_features, prepared, num_joints, hidden_dim,
                             out_dtype=jnp.float32):
    """Fused MLP forward. Returns (pred_joints (B,N,3), joint_features (B,N,H))."""
    B, in_features = global_features.shape
    w1, b1, w2, b2, w3j, b3j, w3f, b3f = prepared
    compute_dtype = w1.dtype

    hidden2 = 2 * hidden_dim
    joints_dim = num_joints * 3
    joints_pad = w3j.shape[1]
    feats_dim = num_joints * hidden_dim

    x = global_features.astype(compute_dtype)

    # Batch tile: dtype-aware sublane rounding; aim for >=2 grid steps so the
    # "parallel" batch axis can be split across both v7x TensorCores.
    itemsize = jnp.dtype(compute_dtype).itemsize
    sub = {4: 8, 2: 16, 1: 32}.get(itemsize, 8)
    tile_b = _round_up(max(pl.cdiv(B, 2), 1), sub)
    tile_b = min(tile_b, 256, _round_up(B, sub))

    # Feature-head column tile: bounds VMEM independent of N*H.
    tile_f = feats_dim if feats_dim <= 2048 else 2048

    grid = (pl.cdiv(B, tile_b), pl.cdiv(feats_dim, tile_f))

    def _resident(shape):
        idx = lambda i, j: (0, 0)
        try:
            # Constant block index -> a single buffer is enough.
            return pl.BlockSpec(shape, idx, pipeline_mode=pl.Buffered(1))
        except (TypeError, AttributeError):
            return pl.BlockSpec(shape, idx)

    cost = pl.CostEstimate(
        flops=2 * B * (in_features * hidden_dim
                       + hidden_dim * hidden2
                       + hidden2 * (joints_pad + feats_dim)),
        transcendentals=0,
        bytes_accessed=(x.size * x.dtype.itemsize
                        + sum(a.size * a.dtype.itemsize for a in prepared)
                        + B * (joints_pad + feats_dim) * jnp.dtype(out_dtype).itemsize),
    )

    joints_flat, feats_flat = pl.pallas_call(
        skeleton_decoder_kernel,
        out_shape=(
            jax.ShapeDtypeStruct((B, joints_pad), out_dtype),
            jax.ShapeDtypeStruct((B, feats_dim), out_dtype),
        ),
        grid=grid,
        in_specs=[
            pl.BlockSpec((tile_b, in_features), lambda i, j: (i, 0)),   # x
            _resident(w1.shape), _resident(b1.shape),                   # layer 1
            _resident(w2.shape), _resident(b2.shape),                   # layer 2
            _resident(w3j.shape), _resident(b3j.shape),                 # joints head
            pl.BlockSpec((hidden2, tile_f), lambda i, j: (0, j)),       # w3f (streamed)
            pl.BlockSpec((1, tile_f), lambda i, j: (0, j)),             # b3f (streamed)
        ],
        out_specs=(
            pl.BlockSpec((tile_b, joints_pad), lambda i, j: (i, 0)),
            pl.BlockSpec((tile_b, tile_f), lambda i, j: (i, j)),
        ),
        scratch_shapes=[pltpu.VMEM((tile_b, hidden2), compute_dtype)],
        compiler_params=pltpu.CompilerParams(
            dimension_semantics=("parallel", "arbitrary"),
            vmem_limit_bytes=_vmem_limit_bytes()),
        cost_estimate=cost,
    )(x, w1, b1, w2, b2, w3j, b3j, w3f, b3f)

    # Contiguous slice / reshapes only -- no strided gather.
    pred_joints = joints_flat[:, :joints_dim].reshape(B, num_joints, 3)
    joint_features = feats_flat.reshape(B, num_joints, hidden_dim)
    return pred_joints, joint_features


def init_params(key, in_features, hidden_dim, num_joints):
    """Deterministic synthetic init (PyTorch-Linear-like uniform fan-in scaling)."""
    def linear(k, fan_in, fan_out):
        kw, kb = jax.random.split(k)
        bound = 1.0 / jnp.sqrt(fan_in)
        w = jax.random.uniform(kw, (fan_in, fan_out), jnp.float32, -bound, bound)
        b = jax.random.uniform(kb, (1, fan_out), jnp.float32, -bound, bound)
        return w, b

    k1, k2, k3 = jax.random.split(key, 3)
    w1, b1 = linear(k1, in_features, hidden_dim)
    w2, b2 = linear(k2, hidden_dim, hidden_dim * 2)
    w3, b3 = linear(k3, hidden_dim * 2, num_joints * (3 + hidden_dim))
    return (w1, b1, w2, b2, w3, b3)


def reference_forward(global_features, params, num_joints, hidden_dim):
    """Pure-JAX reference of the PyTorch forward pass (for correctness check)."""
    w1, b1, w2, b2, w3, b3 = params
    h1 = jnp.maximum(global_features @ w1 + b1, 0.0)
    h2 = jnp.maximum(h1 @ w2 + b2, 0.0)
    out = h2 @ w3 + b3
    B = global_features.shape[0]
    out = out.reshape(B, num_joints, 3 + hidden_dim)
    return out[..., :3], out[..., 3:]


if __name__ == "__main__":
    B = 2
    in_features = 32
    hidden_dim = 32
    num_joints = 8

    key = jax.random.PRNGKey(0)
    k_x, k_p = jax.random.split(key)
    x = jax.random.normal(k_x, (B, in_features), dtype=jnp.float32)
    params = init_params(k_p, in_features, hidden_dim, num_joints)

    # f32 compute path (strict check against the reference).
    prep_f32 = prepare_params(params, num_joints, hidden_dim,
                              compute_dtype=jnp.float32)
    pj32, jf32 = skeleton_decoder_forward(x, prep_f32, num_joints=num_joints,
                                          hidden_dim=hidden_dim)
    jax.block_until_ready((pj32, jf32))

    # bf16 compute path (default: full-rate MXU, half weight VMEM / x DMA).
    prep_bf16 = prepare_params(params, num_joints, hidden_dim)
    pj16, jf16 = skeleton_decoder_forward(x, prep_bf16, num_joints=num_joints,
                                          hidden_dim=hidden_dim)
    jax.block_until_ready((pj16, jf16))

    ref_j, ref_f = reference_forward(x, params, num_joints, hidden_dim)
    assert pj32.shape == (B, num_joints, 3)
    assert jf32.shape == (B, num_joints, hidden_dim)
    assert jnp.allclose(pj32, ref_j, atol=1e-5, rtol=1e-5)
    assert jnp.allclose(jf32, ref_f, atol=1e-5, rtol=1e-5)
    # bf16 weights/activations -> looser tolerance.
    assert jnp.allclose(pj16, ref_j, atol=7e-2, rtol=7e-2)
    assert jnp.allclose(jf16, ref_f, atol=7e-2, rtol=7e-2)

    print("KERNEL_OK")
</pallas_src>

<mosaic_0001>
module attributes {stable_mosaic.version = 11 : i64} {
  func.func @skeleton_decoder_kernel(%arg0: i32, %arg1: i32, %arg2: memref<8x32xf32, #tpu.memory_space<vmem>>, %arg3: memref<32x32xf32, #tpu.memory_space<vmem>>, %arg4: memref<1x32xf32, #tpu.memory_space<vmem>>, %arg5: memref<32x64xf32, #tpu.memory_space<vmem>>, %arg6: memref<1x64xf32, #tpu.memory_space<vmem>>, %arg7: memref<64x128xf32, #tpu.memory_space<vmem>>, %arg8: memref<1x128xf32, #tpu.memory_space<vmem>>, %arg9: memref<64x256xf32, #tpu.memory_space<vmem>>, %arg10: memref<1x256xf32, #tpu.memory_space<vmem>>, %arg11: memref<8x128xf32, #tpu.memory_space<vmem>>, %arg12: memref<8x256xf32, #tpu.memory_space<vmem>>, %arg13: memref<8x64xf32, #tpu.memory_space<vmem>>) attributes {dimension_semantics = [#tpu.dimension_semantics<parallel>, #tpu.dimension_semantics<arbitrary>], iteration_bounds = array<i64: 1, 1>, scalar_prefetch = 0 : i64, scratch_operands = 1 : i64, tpu.core_type = #tpu.core_type<tc>, window_params = [{transform_indices = @transform_0, window_bounds = array<i64: 8, 32>}, {pipeline_mode = #tpu.pipeline_mode<synchronous>, transform_indices = @transform_1, window_bounds = array<i64: 32, 32>}, {pipeline_mode = #tpu.pipeline_mode<synchronous>, transform_indices = @transform_2, window_bounds = array<i64: 1, 32>}, {pipeline_mode = #tpu.pipeline_mode<synchronous>, transform_indices = @transform_3, window_bounds = array<i64: 32, 64>}, {pipeline_mode = #tpu.pipeline_mode<synchronous>, transform_indices = @transform_4, window_bounds = array<i64: 1, 64>}, {pipeline_mode = #tpu.pipeline_mode<synchronous>, transform_indices = @transform_5, window_bounds = array<i64: 64, 128>}, {pipeline_mode = #tpu.pipeline_mode<synchronous>, transform_indices = @transform_6, window_bounds = array<i64: 1, 128>}, {transform_indices = @transform_7, window_bounds = array<i64: 64, 256>}, {transform_indices = @transform_8, window_bounds = array<i64: 1, 256>}, {transform_indices = @transform_9, window_bounds = array<i64: 8, 128>}, {transform_indices = @transform_10, window_bounds = array<i64: 8, 256>}]} {
    %c0_i32 = arith.constant 0 : i32
    %0 = arith.cmpi eq, %arg1, %c0_i32 : i32
    %1 = arith.extui %0 : i1 to i32
    %c0_i32_0 = arith.constant 0 : i32
    %2 = arith.cmpi ne, %1, %c0_i32_0 : i32
    scf.if %2 {
      %c0_10 = arith.constant 0 : index
      %c0_11 = arith.constant 0 : index
      %13 = vector.load %arg2[%c0_10, %c0_11] : memref<8x32xf32, #tpu.memory_space<vmem>>, vector<8x32xf32>
      %c0_12 = arith.constant 0 : index
      %c0_13 = arith.constant 0 : index
      %14 = vector.load %arg3[%c0_12, %c0_13] : memref<32x32xf32, #tpu.memory_space<vmem>>, vector<32x32xf32>
      %cst_14 = arith.constant dense<0.000000e+00> : vector<8x32xf32>
      %15 = tpu.matmul %13, %14, %cst_14 {dimension_numbers = #tpu.dot_dimension_numbers<[1], [0], [0], [1], [0, 0, 1, 1], [], []>} : vector<8x32xf32>, vector<32x32xf32>, vector<8x32xf32> -> vector<8x32xf32>
      %c0_15 = arith.constant 0 : index
      %c0_16 = arith.constant 0 : index
      %16 = vector.load %arg4[%c0_15, %c0_16] : memref<1x32xf32, #tpu.memory_space<vmem>>, vector<1x32xf32>
      %17 = vector.broadcast %16 : vector<1x32xf32> to vector<8x32xf32>
      %18 = arith.addf %15, %17 : vector<8x32xf32>
      %cst_17 = arith.constant 0.000000e+00 : f32
      %19 = vector.broadcast %cst_17 : f32 to vector<8x32xf32>
      %20 = arith.maximumf %18, %19 : vector<8x32xf32>
      %c0_18 = arith.constant 0 : index
      %c0_19 = arith.constant 0 : index
      %21 = vector.load %arg5[%c0_18, %c0_19] : memref<32x64xf32, #tpu.memory_space<vmem>>, vector<32x64xf32>
      %cst_20 = arith.constant dense<0.000000e+00> : vector<8x64xf32>
      %22 = tpu.matmul %20, %21, %cst_20 {dimension_numbers = #tpu.dot_dimension_numbers<[1], [0], [0], [1], [0, 0, 1, 1], [], []>} : vector<8x32xf32>, vector<32x64xf32>, vector<8x64xf32> -> vector<8x64xf32>
      %c0_21 = arith.constant 0 : index
      %c0_22 = arith.constant 0 : index
      %23 = vector.load %arg6[%c0_21, %c0_22] : memref<1x64xf32, #tpu.memory_space<vmem>>, vector<1x64xf32>
      %24 = vector.broadcast %23 : vector<1x64xf32> to vector<8x64xf32>
      %25 = arith.addf %22, %24 : vector<8x64xf32>
      %cst_23 = arith.constant 0.000000e+00 : f32
      %26 = vector.broadcast %cst_23 : f32 to vector<8x64xf32>
      %27 = arith.maximumf %25, %26 : vector<8x64xf32>
      %c0_24 = arith.constant 0 : index
      %c0_25 = arith.constant 0 : index
      %28 = vector.load %arg13[%c0_24, %c0_25] : memref<8x64xf32, #tpu.memory_space<vmem>>, vector<8x64xf32>
      tpu.vector_store %arg13[%c0_24, %c0_25], %27 {strides = array<i32>} : memref<8x64xf32, #tpu.memory_space<vmem>>, vector<8x64xf32>,
    } else {
    }
    %c0 = arith.constant 0 : index
    %c0_1 = arith.constant 0 : index
    %3 = vector.load %arg13[%c0, %c0_1] : memref<8x64xf32, #tpu.memory_space<vmem>>, vector<8x64xf32>
    %c0_2 = arith.constant 0 : index
    %c0_3 = arith.constant 0 : index
    %4 = vector.load %arg9[%c0_2, %c0_3] : memref<64x256xf32, #tpu.memory_space<vmem>>, vector<64x256xf32>
    %cst = arith.constant dense<0.000000e+00> : vector<8x256xf32>
    %5 = tpu.matmul %3, %4, %cst {dimension_numbers = #tpu.dot_dimension_numbers<[1], [0], [0], [1], [0, 0, 1, 1], [], []>} : vector<8x64xf32>, vector<64x256xf32>, vector<8x256xf32> -> vector<8x256xf32>
    %c0_4 = arith.constant 0 : index
    %c0_5 = arith.constant 0 : index
    %6 = vector.load %arg10[%c0_4, %c0_5] : memref<1x256xf32, #tpu.memory_space<vmem>>, vector<1x256xf32>
    %7 = vector.broadcast %6 : vector<1x256xf32> to vector<8x256xf32>
    %8 = arith.addf %5, %7 : vector<8x256xf32>
    %c0_6 = arith.constant 0 : index
    %c0_7 = arith.constant 0 : index
    %9 = vector.load %arg12[%c0_6, %c0_7] : memref<8x256xf32, #tpu.memory_space<vmem>>, vector<8x256xf32>
    tpu.vector_store %arg12[%c0_6, %c0_7], %8 {strides = array<i32>} : memref<8x256xf32, #tpu.memory_space<vmem>>, vector<8x256xf32>,
    %c0_i32_8 = arith.constant 0 : i32
    %10 = arith.cmpi eq, %arg1, %c0_i32_8 : i32
    %11 = arith.extui %10 : i1 to i32
    %c0_i32_9 = arith.constant 0 : i32
    %12 = arith.cmpi ne, %11, %c0_i32_9 : i32
    scf.if %12 {
      %c0_10 = arith.constant 0 : index
      %c0_11 = arith.constant 0 : index
      %13 = vector.load %arg13[%c0_10, %c0_11] : memref<8x64xf32, #tpu.memory_space<vmem>>, vector<8x64xf32>
      %c0_12 = arith.constant 0 : index
      %c0_13 = arith.constant 0 : index
      %14 = vector.load %arg7[%c0_12, %c0_13] : memref<64x128xf32, #tpu.memory_space<vmem>>, vector<64x128xf32>
      %cst_14 = arith.constant dense<0.000000e+00> : vector<8x128xf32>
      %15 = tpu.matmul %13, %14, %cst_14 {dimension_numbers = #tpu.dot_dimension_numbers<[1], [0], [0], [1], [0, 0, 1, 1], [], []>} : vector<8x64xf32>, vector<64x128xf32>, vector<8x128xf32> -> vector<8x128xf32>
      %c0_15 = arith.constant 0 : index
      %c0_16 = arith.constant 0 : index
      %16 = vector.load %arg8[%c0_15, %c0_16] : memref<1x128xf32, #tpu.memory_space<vmem>>, vector<1x128xf32>
      %17 = vector.broadcast %16 : vector<1x128xf32> to vector<8x128xf32>
      %18 = arith.addf %15, %17 : vector<8x128xf32>
      %c0_17 = arith.constant 0 : index
      %c0_18 = arith.constant 0 : index
      %19 = vector.load %arg11[%c0_17, %c0_18] : memref<8x128xf32, #tpu.memory_space<vmem>>, vector<8x128xf32>
      tpu.vector_store %arg11[%c0_17, %c0_18], %18 {strides = array<i32>} : memref<8x128xf32, #tpu.memory_space<vmem>>, vector<8x128xf32>,
    } else {
    }
    return
  }
  func.func @transform_0(%arg0: i32, %arg1: i32) -> (i32, i32) {
    %c0_i32 = arith.constant 0 : i32
    %c0_i32_0 = arith.constant 0 : i32
    return %arg0, %c0_i32 : i32, i32
  }
  func.func @transform_1(%arg0: i32, %arg1: i32) -> (i32, i32) {
    %c0_i32 = arith.constant 0 : i32
    %c0_i32_0 = arith.constant 0 : i32
    %c0_i32_1 = arith.constant 0 : i32
    return %c0_i32, %c0_i32_0 : i32, i32
  }
  func.func @transform_2(%arg0: i32, %arg1: i32) -> (i32, i32) {
    %c0_i32 = arith.constant 0 : i32
    %c0_i32_0 = arith.constant 0 : i32
    %c0_i32_1 = arith.constant 0 : i32
    return %c0_i32, %c0_i32_0 : i32, i32
  }
  func.func @transform_3(%arg0: i32, %arg1: i32) -> (i32, i32) {
    %c0_i32 = arith.constant 0 : i32
    %c0_i32_0 = arith.constant 0 : i32
    %c0_i32_1 = arith.constant 0 : i32
    return %c0_i32, %c0_i32_0 : i32, i32
  }
  func.func @transform_4(%arg0: i32, %arg1: i32) -> (i32, i32) {
    %c0_i32 = arith.constant 0 : i32
    %c0_i32_0 = arith.constant 0 : i32
    %c0_i32_1 = arith.constant 0 : i32
    return %c0_i32, %c0_i32_0 : i32, i32
  }
  func.func @transform_5(%arg0: i32, %arg1: i32) -> (i32, i32) {
    %c0_i32 = arith.constant 0 : i32
    %c0_i32_0 = arith.constant 0 : i32
    %c0_i32_1 = arith.constant 0 : i32
    return %c0_i32, %c0_i32_0 : i32, i32
  }
  func.func @transform_6(%arg0: i32, %arg1: i32) -> (i32, i32) {
    %c0_i32 = arith.constant 0 : i32
    %c0_i32_0 = arith.constant 0 : i32
    %c0_i32_1 = arith.constant 0 : i32
    return %c0_i32, %c0_i32_0 : i32, i32
  }
  func.func @transform_7(%arg0: i32, %arg1: i32) -> (i32, i32) {
    %c0_i32 = arith.constant 0 : i32
    %c0_i32_0 = arith.constant 0 : i32
    return %c0_i32, %arg1 : i32, i32
  }
  func.func @transform_8(%arg0: i32, %arg1: i32) -> (i32, i32) {
    %c0_i32 = arith.constant 0 : i32
    %c0_i32_0 = arith.constant 0 : i32
    return %c0_i32, %arg1 : i32, i32
  }
  func.func @transform_9(%arg0: i32, %arg1: i32) -> (i32, i32) {
    %c0_i32 = arith.constant 0 : i32
    %c0_i32_0 = arith.constant 0 : i32
    return %arg0, %c0_i32 : i32, i32
  }
  func.func @transform_10(%arg0: i32, %arg1: i32) -> (i32, i32) {
    %c0_i32 = arith.constant 0 : i32
    return %arg0, %arg1 : i32, i32
  }
}

</mosaic_0001>

<bundles_post_ra>
// kernel: skeleton_decoder_forward.1
= control target key start
LH: loop header
LB: loop body
LE: loop exit
PB: predicated region body
PF: predicated region fallthrough
CT: control target
= control target key end

     0   :  { %16 = vsyncpa [#allocation4], 0  ;;  %s995_s0 = inlined_call_operand.hbm [shape: f32[2,32], index: 0, kind: input, shape index: {}]   ;;  %s996_s1 = inlined_call_operand.hbm [shape: f32[32,32], index: 1, kind: input, shape index: {}]   ;;  %s997_s2 = inlined_call_operand.vmem [shape: f32[1,32], index: 2, kind: input, shape index: {}]   ;;  %s998_s3 = inlined_call_operand.hbm [shape: f32[32,64], index: 3, kind: input, shape index: {}]   ;;  %s999_s4 = inlined_call_operand.vmem [shape: f32[1,64], index: 4, kind: input, shape index: {}]   ;;  %s1000_s5 = inlined_call_operand.hbm [shape: f32[64,128], index: 5, kind: input, shape index: {}]   ;;  %s1001_s6 = inlined_call_operand.vmem [shape: f32[1,128], index: 6, kind: input, shape index: {}]   ;;  %s1002_s7 = inlined_call_operand.hbm [shape: f32[64,256], index: 7, kind: input, shape index: {}]   ;;  %s1003_s8 = inlined_call_operand.vmem [shape: f32[1,256], index: 8, kind: input, shape index: {}]   ;;  %s1004_s9 = inlined_call_operand.vmem [shape: f32[2,128], index: 9, kind: output, shape index: {0}]   ;;  %s1005_s10 = inlined_call_operand.vmem [shape: f32[2,256], index: 10, kind: output, shape index: {1}]  }
   0x1   :  { %17 = vsyncpa [#allocation6], 0 }
   0x2   :  { %18 = vsyncpa [#allocation9], 0 }
   0x3   :  { %23 = vsyncadd [#allocation4], 96  ;;  %s826_s13 = smov [#allocation5]   ;;  %s710_s17 = scalar_lea.hbm %s996_s1, 512 }
   0x4   :  { %s36_s14 = sshll.u32 %s826_s13, 4  ;;  %p711_p0 = scmp.ne.s32.totalorder %s996_s1, %s710_s17  ;;  %s37_s14 = int_to_ptr.vmem [resolvable:$true] %s36_s14 }
   0x5   :  { %p714_p1 = scmp.lt.u32.totalorder %s710_s17, %s996_s1 }
   0x7   :  { %p716_p2 = pnand %p714_p1, %p711_p0 }
   0x9   :  { %719 = shalt.err (!%p716_p2)
}
   0xa   :  { %s720_s22 = scalar_lea.vmem %s37_s14, 512  ;;  %p725_p4 = scmp.lt.s32.totalorder %s37_s14, %s37_s14 }
   0xb   :  { %p721_p3 = scmp.ne.s32.totalorder %s37_s14, %s720_s22  ;;  %p726_p5 = scmp.lt.s32.totalorder %s720_s22, %s720_s22 }
   0xd   :  { %p727_p6 = por %p726_p5, %p725_p4 }
   0xf   :  { %p728_p7 = pnand %p727_p6, %p721_p3 }
  0x11   :  { %731 = shalt.err (!%p728_p7)
}
  0x12   :  { %s827_s23 = smov 128   ;;  %s828_s24 = smov 8  }
  0x13   :  { %42 = dma.hbm_to_vmem [thread:$0]  %s996_s1, 512, %s37_s14, [#allocation6], %s827_s23, %s827_s23, %s828_s24  }
  0x14   :  { %s829_s27 = smov [#allocation8]   ;;  %s830_s29 = smov [#allocation3]  }
  0x15   :  { %s64_s28 = sshll.u32 %s829_s27, 4  ;;  %s24_s30 = sshll.u32 %s830_s29, 4  ;;  %s65_s28 = int_to_ptr.vmem [resolvable:$true] %s64_s28  ;;  %s25_s30 = int_to_ptr.vmem [resolvable:$true] %s24_s30 }
  0x16   :  { %s732_s13 = scalar_lea.hbm %s1000_s5, 1024 }
  0x17   :  { %p733_p8 = scmp.ne.s32.totalorder %s1000_s5, %s732_s13  ;;  %p736_p9 = scmp.lt.u32.totalorder %s732_s13, %s1000_s5 }
  0x19   :  { %p738_p10 = pnand %p736_p9, %p733_p8 }
  0x1b   :  { %741 = shalt.err (!%p738_p10)
}
  0x1c   :  { %s742_s1 = scalar_lea.vmem %s65_s28, 1024  ;;  %p747_p12 = scmp.lt.s32.totalorder %s65_s28, %s65_s28 }
  0x1d   :  { %p743_p11 = scmp.ne.s32.totalorder %s65_s28, %s742_s1  ;;  %p748_p13 = scmp.lt.s32.totalorder %s742_s1, %s742_s1 }
  0x1f   :  { %p749_p0 = por %p748_p13, %p747_p12 }
  0x21   :  { %p750_p1 = pnand %p749_p0, %p743_p11 }
  0x23   :  { %753 = shalt.err (!%p750_p1)
}
  0x24   :  { %70 = dma.hbm_to_vmem [thread:$0]  %s1000_s5, 1024, %s65_s28, [#allocation9], %s827_s23, %s827_s23, %s828_s24  }
  0x25   :  { %s754_s22 = scalar_lea.hbm %s995_s0, 32 }
  0x26   :  { %p755_p2 = scmp.ne.s32.totalorder %s995_s0, %s754_s22  ;;  %p758_p3 = scmp.lt.u32.totalorder %s754_s22, %s995_s0 }
  0x28   :  { %p760_p4 = pnand %p758_p3, %p755_p2 }
  0x2a   :  { %763 = shalt.err (!%p760_p4)
}
  0x2b   :  { %s764_s11 = scalar_lea.vmem %s25_s30, 32  ;;  %s768_s12 = scalar_lea.vmem %s25_s30, 128 }
  0x2c   :  { %p765_p5 = scmp.ne.s32.totalorder %s25_s30, %s764_s11  ;;  %p769_p6 = scmp.lt.s32.totalorder %s25_s30, %s25_s30 }
  0x2d   :  { %p770_p7 = scmp.lt.s32.totalorder %s768_s12, %s764_s11 }
  0x2f   :  { %p771_p8 = por %p770_p7, %p769_p6 }
  0x31   :  { %p772_p9 = pnand %p771_p8, %p765_p5 }
  0x33   :  { %775 = shalt.err (!%p772_p9)
}
  0x34   :  { %s831_s5 = smov 32   ;;  %s832_s28 = smov 2  }
  0x35   :  { %30 = dma.hbm_to_vmem [thread:$0]  %s995_s0, 32, %s25_s30, [#allocation4], %s831_s5, %s831_s5, %s832_s28  }
  0x36   :  { %s833_s16 = smov [#allocation7]   ;;  %s834_s18 = smov [#allocation10]  }
  0x37   :  { %s50_s17 = sshll.u32 %s833_s16, 4  ;;  %s78_s1 = sshll.u32 %s834_s18, 4  ;;  %s51_s17 = int_to_ptr.vmem [resolvable:$true] %s50_s17  ;;  %s79_s1 = int_to_ptr.vmem [resolvable:$true] %s78_s1 }
  0x38   :  { %s776_s20 = scalar_lea.hbm %s998_s3, 512 }
  0x39   :  { %p777_p10 = scmp.ne.s32.totalorder %s998_s3, %s776_s20  ;;  %p780_p11 = scmp.lt.u32.totalorder %s776_s20, %s998_s3 }
  0x3b   :  { %p782_p12 = pnand %p780_p11, %p777_p10 }
  0x3d   :  { %785 = shalt.err (!%p782_p12)
}
  0x3e   :  { %s786_s0 = scalar_lea.vmem %s51_s17, 512  ;;  %p791_p0 = scmp.lt.s32.totalorder %s51_s17, %s51_s17 }
  0x3f   :  { %p787_p13 = scmp.ne.s32.totalorder %s51_s17, %s786_s0  ;;  %p792_p1 = scmp.lt.s32.totalorder %s786_s0, %s786_s0 }
  0x41   :  { %p793_p2 = por %p792_p1, %p791_p0 }
  0x43   :  { %p794_p3 = pnand %p793_p2, %p787_p13 }
  0x45   :  { %797 = shalt.err (!%p794_p3)
}
  0x46   :  { %56 = dma.hbm_to_vmem [thread:$0]  %s998_s3, 512, %s51_s17, [#allocation6], %s827_s23, %s827_s23, %s828_s24  }
  0x47   :  { %s798_s12 = scalar_lea.hbm %s1002_s7, 2048 }
  0x48   :  { %p799_p4 = scmp.ne.s32.totalorder %s1002_s7, %s798_s12  ;;  %p802_p5 = scmp.lt.u32.totalorder %s798_s12, %s1002_s7 }
  0x4a   :  { %p804_p6 = pnand %p802_p5, %p799_p4 }
  0x4c   :  { %807 = shalt.err (!%p804_p6)
}
  0x4d   :  { %s808_s16 = scalar_lea.vmem %s79_s1, 2048  ;;  %p813_p8 = scmp.lt.s32.totalorder %s79_s1, %s79_s1 }
  0x4e   :  { %p809_p7 = scmp.ne.s32.totalorder %s79_s1, %s808_s16  ;;  %p814_p9 = scmp.lt.s32.totalorder %s808_s16, %s808_s16 }
  0x50   :  { %p815_p10 = por %p814_p9, %p813_p8 }
  0x52   :  { %p816_p11 = pnand %p815_p10, %p809_p7 }
  0x54   :  { %819 = shalt.err (!%p816_p11)
}
  0x55   :  { %s835_s3 = smov 256   ;;  %s836_s23 = smov 16  }
  0x56   :  { %84 = dma.hbm_to_vmem [thread:$0]  %s1002_s7, 2048, %s79_s1, [#allocation9], %s835_s3, %s835_s3, %s836_s23  }
  0x57   :  { %820 = dma.done.wait [#allocation4], 128  }
  0x58   :  { %821 = vsyncadd [#allocation4], 4294967168 }
  0x59   :  { %822 = dma.done.wait [#allocation6], 1024  }
  0x5a   :  { %823 = vsyncadd [#allocation6], 4294966272 }
  0x5b   :  { %824 = dma.done.wait [#allocation9], 3072  }
  0x5c   :  { %825 = vsyncadd [#allocation9], 4294964224  ;;  %v837_v0 = vmov 0.0|0.0   ;;  %vm838_vm0 = vmmov 0   ;;  %v839_v1 = vmov 0.0   ;;  %v107_v2 = vld [vmem:[#allocation5] sm:$0xff]  ;;  %v299_v62 = vlaneseq }
  0x5d   :  { %655 = vmatprep.subr.bf16.mxu0 %v837_v0  ;;  %622 = vmatprep.mubr.msk.f32.mxu0 %vm838_vm0, %v839_v1  ;;  %v108_v3 = vld [vmem:[#allocation5 + $0x8] sm:$0xff]  ;;  %v109_v4 = vld [vmem:[#allocation5 + $0x10] sm:$0xff]  ;;  %v110_v6 = vld [vmem:[#allocation5 + $0x18] sm:$0xff]  ;;  %vm118_vm1 = vcmask 261120   ;;  %vm278_vm2 = vcmask 523264  }
  0x5e   :  { %661 = vmatprep.subr.bf16.mxu1 %v837_v0  ;;  %633 = vmatprep.mubr.msk.f32.mxu1 %vm838_vm0, %v839_v1  ;;  %v656_v5 = vpack.c.bf16 %v108_v3, %v107_v2  ;;  %v193_v7 = vld [vmem:[#allocation7] sm:$0xff]  ;;  %v194_v8 = vld [vmem:[#allocation7 + $0x8] sm:$0xff]  ;;  %v659_v9 = vpack.c.bf16 %v110_v6, %v109_v4  ;;  %v106_v11 = vld [vmem:[#allocation3] sm:$0xff]  ;;  %v300_v63 = vshrl.u32 %v299_v62, 7 }
  0x5f   :  { %v662_v10 = vpack.c.bf16 %v194_v8, %v193_v7  ;;  %v195_v12 = vld [vmem:[#allocation7 + $0x10] sm:$0xff]  ;;  %v196_v13 = vld [vmem:[#allocation7 + $0x18] sm:$0xff]  ;;  %v282_v15 = vld [vmem:[#allocation10 + $0x8] sm:$0xff] }
  0x60   :  { %657 = vmatpush3.bf16.msra.mxu0 %v656_v5  ;;  %v665_v14 = vpack.c.bf16 %v196_v13, %v195_v12  ;;  %v284_v16 = vld [vmem:[#allocation10 + $0x18] sm:$0xff]  ;;  %v281_v17 = vld [vmem:[#allocation10] sm:$0xff]  ;;  %v283_v19 = vld [vmem:[#allocation10 + $0x10] sm:$0xff]  ;;  %v305_v2 = vsub.s32 1, %v300_v63 }
  0x61   :  { %658 = vmatprep.subr.bf16.mxu0 %v837_v0  ;;  %663 = vmatpush3.bf16.msra.mxu1 %v662_v10  ;;  %v667_v18 = vpack.c.bf16 %v284_v16, %v282_v15  ;;  %v669_v20 = vpack.c.bf16 %v283_v19, %v281_v17  ;;  %v586_v21 = vld [vmem:[%s997_s2] ss:$0 sm:$0xff]  ;;  %v416_v22 = vld [vmem:[#allocation8] sm:$0xff]  ;;  %v288_v30 = vld [vmem:[#allocation10 + $0x38] sm:$0xff] }
  0x62   :  { %664 = vmatprep.subr.bf16.mxu1 %v837_v0  ;;  %v417_v23 = vld [vmem:[#allocation8 + $0x8] sm:$0xff]  ;;  %v285_v32 = vld [vmem:[#allocation10 + $0x20] sm:$0xff]  ;;  %v287_v33 = vld [vmem:[#allocation10 + $0x30] sm:$0xff] }
  0x63   :  { %v684_v27 = vpack.c.bf16 %v417_v23, %v416_v22  ;;  %v286_v29 = vld [vmem:[#allocation10 + $0x28] sm:$0xff]  ;;  %v418_v34 = vld [vmem:[#allocation8 + $0x10] sm:$0xff]  ;;  %v673_v35 = vpack.c.bf16 %v287_v33, %v285_v32  ;;  %v419_v36 = vld [vmem:[#allocation8 + $0x18] sm:$0xff] }
  0x64   :  { %660 = vmatpush3.bf16.msra.mxu0 %v659_v9  ;;  %v671_v31 = vpack.c.bf16 %v288_v30, %v286_v29  ;;  %v687_v37 = vpack.c.bf16 %v419_v36, %v418_v34  ;;  %v290_v38 = vld [vmem:[#allocation10 + $0x48] sm:$0xff]  ;;  %v292_v39 = vld [vmem:[#allocation10 + $0x58] sm:$0xff]  ;;  %v289_v41 = vld [vmem:[#allocation10 + $0x40] sm:$0xff] }
  0x65   :  { %666 = vmatpush3.bf16.msra.mxu1 %v665_v14  ;;  %668 = vmatprep.subr.bf16.mxu0 %v667_v18  ;;  %v675_v40 = vpack.c.bf16 %v292_v39, %v290_v38  ;;  %v291_v42 = vld [vmem:[#allocation10 + $0x50] sm:$0xff]  ;;  %v420_v43 = vld [vmem:[#allocation8 + $0x20] sm:$0xff]  ;;  %v421_v45 = vld [vmem:[#allocation8 + $0x28] sm:$0xff] }
  0x66   :  { %683 = vmatprep.subr.bf16.mxu1 %v837_v0  ;;  %v677_v44 = vpack.c.bf16 %v291_v42, %v289_v41  ;;  %v690_v46 = vpack.c.bf16 %v421_v45, %v420_v43  ;;  %v294_v47 = vld [vmem:[#allocation10 + $0x68] sm:$0xff]  ;;  %v296_v48 = vld [vmem:[#allocation10 + $0x78] sm:$0xff]  ;;  %v293_v49 = vld [vmem:[#allocation10 + $0x60] sm:$0xff] }
  0x67   :  { %623 = vmatmul.mubr.msk.f32.vlgmr.msra.gmra.mrb[0].mxu0 %vm118_vm1, %v106_v11  ;;  %v679_v50 = vpack.c.bf16 %v296_v48, %v294_v47  ;;  %v295_v51 = vld [vmem:[#allocation10 + $0x70] sm:$0xff]  ;;  %v423_v53 = vld [vmem:[#allocation8 + $0x38] sm:$0xff]  ;;  %v588_v56 = vld [vmem:[%s999_s4] ss:$0 sm:$0xff] }
  0x68   :  { %377 = vmatprep.mubr.f32.mxu0 %v839_v1  ;;  %670 = vmatpush1.bf16.msra.mxu0 %v669_v20  ;;  %v422_v52 = vld [vmem:[#allocation8 + $0x30] sm:$0xff]  ;;  %v681_v54 = vpack.c.bf16 %v295_v51, %v293_v49  ;;  %v593_v4 = vld [vmem:[%s1001_s6] ss:$0 sm:$0xff] }
  0x69   :  { %672 = vmatprep.subr.bf16.mxu0 %v671_v31  ;;  %v693_v55 = vpack.c.bf16 %v423_v53, %v422_v52 }
  0x6c   :  { %674 = vmatpush1.bf16.msra.mxu0 %v673_v35 }
  0x6d   :  { %676 = vmatprep.subr.bf16.mxu0 %v675_v40 }
  0x70   :  { %678 = vmatpush1.bf16.msra.mxu0 %v677_v44 }
  0x71   :  { %680 = vmatprep.subr.bf16.mxu0 %v679_v50 }
  0x74   :  { %682 = vmatpush1.bf16.msra.mxu0 %v681_v54 }
 0x13a   :  { %v188_v24 = vpop.f32.mrb[0].mxu0 }
 0x13b   :  { %v189_v25 = vadd.f32 %v586_v21, %v188_v24  ;;  %v624_v26 = vpop.f32.mrb[1].mxu0 }
 0x13d   :  { %v192_v28 = vmax.f32 %v189_v25, 0.0 }
 0x13f   :  { %634 = vmatmul.mubr.msk.f32.vlgmr.msra.gmra.mrb[0].mxu1 %vm118_vm1, %v192_v28 }
 0x140   :  { %685 = vmatpush3.bf16.msra.mxu1 %v684_v27  ;;  %652 = vmatprep.mubr.msk.f32.mxu1 %vm838_vm0, %v839_v1  ;;  %v301_v1 = vsub.s32 0, %v300_v63 }
 0x141   :  { %686 = vmatprep.subr.bf16.mxu1 %v837_v0 }
 0x144   :  { %688 = vmatpush3.bf16.msra.mxu1 %v687_v37 }
 0x145   :  { %689 = vmatprep.subr.bf16.mxu1 %v837_v0 }
 0x148   :  { %691 = vmatpush3.bf16.msra.mxu1 %v690_v46 }
 0x149   :  { %692 = vmatprep.subr.bf16.mxu1 %v837_v0  ;;  %v297_v0 = vld [vmem:[%s1003_s8] sm:$0x3] }
 0x14a   :  { %v302_v3 = vrot.slane %v297_v0, %v301_v1  ;;  %v306_v5 = vrot.slane %v297_v0, %v305_v2 }
 0x14c   :  { %694 = vmatpush3.bf16.msra.mxu1 %v693_v55 }
 0x212   :  { %v273_v57 = vpop.f32.mrb[0].mxu1 }
 0x213   :  { %v274_v58 = vadd.f32 %v588_v56, %v273_v57  ;;  %v635_v59 = vpop.f32.mrb[1].mxu1 }
 0x215   :  { %v277_v60 = vmax.f32 %v274_v58, 0.0 }
 0x217   :  { %279 = vst.msk [vmem:[#allocation2] sm:$0xff] %vm278_vm2, %v277_v60 }
 0x21e   :  { %v280_v61 = vld [vmem:[#allocation2] sm:$0xff] }
 0x21f   :  { %590 = vmatmul.mubr.msk.f32.vlgmr.msra.gmra.mrb[2].mxu0 %vm278_vm2, %v280_v61  ;;  %653 = vmatmul.mubr.msk.f32.vlgmr.msra.gmra.mrb[2].mxu1 %vm278_vm2, %v280_v61 }
 0x2f2   :  { %v379_v6 = vpop.f32.mrb[2].mxu0  ;;  %v500_v7 = vpop.f32.mrb[2].mxu1 }
 0x2f3   :  { %v380_v8 = vadd.f32 %v379_v6, %v302_v3  ;;  %v501_v9 = vadd.f32 %v593_v4, %v500_v7  ;;  %v381_v10 = vpop.f32.mrb[3].mxu0  ;;  %v654_v11 = vpop.f32.mrb[3].mxu1 }
 0x2f4   :  { %v382_v12 = vadd.f32 %v381_v10, %v306_v5 }
 0x2f5   :  { %504 = vst [vmem:[#allocation11] sm:$0xff] %v501_v9 }
 0x2f6   :  { %v386_v13 = vcombine.low %v380_v8, %v382_v12 }
 0x2f8   :  { %591 = vst.sshfl [vmem:[#allocation12] sm:$0x33 pattern:$0x76325410] %v386_v13 }
 0x2fc   :  { %v522_v14 = vld [vmem:[#allocation11] sm:$0x3] }
 0x2fd   :  { %523 = vst [vmem:[%s1004_s9] sm:$0x3] %v522_v14 }
 0x2ff   :  { %v555_v15 = vld [vmem:[#allocation12] sm:$0xf] }
 0x300   :  { %556 = vst [vmem:[%s1005_s10] sm:$0xf] %v555_v15 }
 0x301   :  { %575 = vsyncpa [#allocation4], 1 }
 0x302   :  { %576 = vsyncpa [#allocation6], 1 }
 0x303   :  { %577 = vsyncpa [#allocation9], 1 }

</bundles_post_ra>
